<compile_context>
chip_gen: v5e
topology: v5e:2x2
jax: 0.10.0
libtpu: 0.0.40
codegen_flags: <defaults>
</compile_context>

<pallas_src>
import jax
import jax.numpy as jnp
from jax.experimental import pallas as pl
from jax.experimental.pallas import tpu as pltpu


def _round_up(x, m):
    return ((x + m - 1) // m) * m


def _hand_add_linear_kernel(img_ref, rad_ref, w1_ref, b1_ref, w2_ref, b2_ref,
                            out_ref):
    # imageLinear: (TB, Di)bf16 @ (Di, Dr)bf16 -> f32 accumulate, then f32 bias.
    h = jnp.dot(img_ref[...], w1_ref[...], preferred_element_type=jnp.float32)
    h = h + b1_ref[...]

    # classifier on concat([h, radio]) == h @ W2_img + radio @ W2_rad + b2.
    # w2_ref is (2, Dr, CP): slot 0 acts on h, slot 1 acts on radio.
    acc = jnp.dot(h.astype(w2_ref.dtype), w2_ref[0],
                  preferred_element_type=jnp.float32)
    acc += jnp.dot(rad_ref[...], w2_ref[1],
                   preferred_element_type=jnp.float32)
    out_ref[...] = (acc + b2_ref[...]).astype(out_ref.dtype)


def hand_add_linear_classifier(image_data, radio_data, params, *, tb=256):
    """Forward pass of HandAddLinearClassifier as one batch-tiled Pallas kernel.

    params: dict with
      w1:     (image_in_dim, radio_in_dim)   (transposed so the kernel does x @ w1)
      b1:     (1, radio_in_dim)
      w2_img: (radio_in_dim, classify_num)   (half of classifier weight acting on h)
      w2_rad: (radio_in_dim, classify_num)   (half acting on radio_data)
      b2:     (1, classify_num)
    """
    B, Di = image_data.shape
    Br, Dr = radio_data.shape
    assert Br == B
    C = params["b2"].shape[-1]

    # ---- lane-dense output: pad classify_num to a multiple of 128 -----------
    CP = _round_up(C, 128)

    # ---- batch tiling (rows padded so the block evenly divides the array) ---
    TB = min(tb, _round_up(B, 8))
    Bp = _round_up(B, TB)
    nb = Bp // TB

    # ---- pack / pad / cast operands (bf16 activations & weights, f32 bias) --
    img = jnp.pad(image_data, ((0, Bp - B), (0, 0))).astype(jnp.bfloat16)
    rad = jnp.pad(radio_data, ((0, Bp - B), (0, 0))).astype(jnp.bfloat16)
    w1 = params["w1"].astype(jnp.bfloat16)
    b1 = params["b1"].astype(jnp.float32)
    w2 = jnp.stack([params["w2_img"], params["w2_rad"]], axis=0)     # (2, Dr, C)
    w2 = jnp.pad(w2, ((0, 0), (0, 0), (0, CP - C))).astype(jnp.bfloat16)
    b2 = jnp.pad(params["b2"], ((0, 0), (0, CP - C))).astype(jnp.float32)

    # ---- VMEM budget: 2x double-buffered activation/out tiles + weights -----
    tile_bytes = 2 * (TB * Di * 2 + TB * Dr * 2 + TB * CP * 4)
    weight_bytes = w1.size * 2 + w2.size * 2 + (b1.size + b2.size) * 4
    vmem_limit = int(min(32 * 1024 * 1024,
                         max(4 * 1024 * 1024, 4 * (tile_bytes + weight_bytes))))

    out = pl.pallas_call(
        _hand_add_linear_kernel,
        out_shape=jax.ShapeDtypeStruct((Bp, CP), jnp.float32),
        grid_spec=pl.GridSpec(
            grid=(nb,),
            in_specs=[
                pl.BlockSpec((TB, Di), lambda i: (i, 0)),       # image tile
                pl.BlockSpec((TB, Dr), lambda i: (i, 0)),       # radio tile
                pl.BlockSpec((Di, Dr), lambda i: (0, 0)),       # w1 (resident)
                pl.BlockSpec((1, Dr), lambda i: (0, 0)),        # b1 (resident)
                pl.BlockSpec((2, Dr, CP), lambda i: (0, 0, 0)),  # w2 (resident)
                pl.BlockSpec((1, CP), lambda i: (0, 0)),        # b2 (resident)
            ],
            out_specs=pl.BlockSpec((TB, CP), lambda i: (i, 0)),
        ),
        compiler_params=pltpu.CompilerParams(
            dimension_semantics=("parallel",),
            vmem_limit_bytes=vmem_limit,
        ),
    )(img, rad, w1, b1, w2, b2)

    return out[:B, :C]


def init_params(key, image_in_dim, radio_in_dim, classify_num=2):
    """Mirror HandAddLinearClassifier.initilize(): weights ~ N(0, 0.01), bias = 0."""
    k1, k2 = jax.random.split(key)
    # PyTorch Linear weight is (out, in); keep the transposed (in, out) form so
    # the kernel computes x @ W, which is identical math.
    w1 = 0.01 * jax.random.normal(k1, (image_in_dim, radio_in_dim), jnp.float32)
    b1 = jnp.zeros((1, radio_in_dim), jnp.float32)
    w2 = 0.01 * jax.random.normal(k2, (radio_in_dim * 2, classify_num), jnp.float32)
    b2 = jnp.zeros((1, classify_num), jnp.float32)
    return {
        "w1": w1,
        "b1": b1,
        "w2_img": w2[:radio_in_dim, :],   # half of classifier weight acting on h
        "w2_rad": w2[radio_in_dim:, :],   # half acting on radio_data
        "b2": b2,
    }


def reference_forward(image_data, radio_data, params):
    # Plain-JAX f32 reference replicating the PyTorch forward (explicit concat).
    h = image_data @ params["w1"] + params["b1"]
    feature = jnp.concatenate([h, radio_data], axis=1)
    w2 = jnp.concatenate([params["w2_img"], params["w2_rad"]], axis=0)
    return feature @ w2 + params["b2"]


if __name__ == "__main__":
    B = 8
    image_in_dim = 32
    radio_in_dim = 16
    classify_num = 2

    key = jax.random.PRNGKey(0)
    k_img, k_rad, k_par = jax.random.split(key, 3)

    image_data = jax.random.normal(k_img, (B, image_in_dim), jnp.float32)
    radio_data = jax.random.normal(k_rad, (B, radio_in_dim), jnp.float32)
    params = init_params(k_par, image_in_dim, radio_in_dim, classify_num)

    out = hand_add_linear_classifier(image_data, radio_data, params)
    out = jax.block_until_ready(out)

    ref = reference_forward(image_data, radio_data, params)
    assert out.shape == (B, classify_num)
    # bf16 activations/weights inside the kernel -> compare to f32 reference
    # with a bf16-appropriate tolerance.
    assert jnp.allclose(out, ref, atol=1e-2, rtol=1e-2)

    print("KERNEL_OK")
</pallas_src>

<mosaic_0001>
module attributes {stable_mosaic.version = 11 : i64} {
  func.func @_hand_add_linear_kernel(%arg0: i32, %arg1: memref<8x32xbf16, #tpu.memory_space<vmem>>, %arg2: memref<8x16xbf16, #tpu.memory_space<vmem>>, %arg3: memref<32x16xbf16, #tpu.memory_space<vmem>>, %arg4: memref<1x16xf32, #tpu.memory_space<vmem>>, %arg5: memref<2x16x128xbf16, #tpu.memory_space<vmem>>, %arg6: memref<1x128xf32, #tpu.memory_space<vmem>>, %arg7: memref<8x128xf32, #tpu.memory_space<vmem>>) attributes {dimension_semantics = [#tpu.dimension_semantics<parallel>], iteration_bounds = array<i64: 1>, scalar_prefetch = 0 : i64, scratch_operands = 0 : i64, tpu.core_type = #tpu.core_type<tc>, window_params = [{transform_indices = @transform_0, window_bounds = array<i64: 8, 32>}, {transform_indices = @transform_1, window_bounds = array<i64: 8, 16>}, {pipeline_mode = #tpu.pipeline_mode<synchronous>, transform_indices = @transform_2, window_bounds = array<i64: 32, 16>}, {pipeline_mode = #tpu.pipeline_mode<synchronous>, transform_indices = @transform_3, window_bounds = array<i64: 1, 16>}, {pipeline_mode = #tpu.pipeline_mode<synchronous>, transform_indices = @transform_4, window_bounds = array<i64: 2, 16, 128>}, {pipeline_mode = #tpu.pipeline_mode<synchronous>, transform_indices = @transform_5, window_bounds = array<i64: 1, 128>}, {transform_indices = @transform_6, window_bounds = array<i64: 8, 128>}]} {
    %c0 = arith.constant 0 : index
    %c0_0 = arith.constant 0 : index
    %0 = vector.load %arg1[%c0, %c0_0] : memref<8x32xbf16, #tpu.memory_space<vmem>>, vector<8x32xbf16>
    %c0_1 = arith.constant 0 : index
    %c0_2 = arith.constant 0 : index
    %1 = vector.load %arg3[%c0_1, %c0_2] : memref<32x16xbf16, #tpu.memory_space<vmem>>, vector<32x16xbf16>
    %cst = arith.constant dense<0.000000e+00> : vector<8x16xf32>
    %2 = tpu.matmul %0, %1, %cst {dimension_numbers = #tpu.dot_dimension_numbers<[1], [0], [0], [1], [0, 0, 1, 1], [], []>} : vector<8x32xbf16>, vector<32x16xbf16>, vector<8x16xf32> -> vector<8x16xf32>
    %c0_3 = arith.constant 0 : index
    %c0_4 = arith.constant 0 : index
    %3 = vector.load %arg4[%c0_3, %c0_4] : memref<1x16xf32, #tpu.memory_space<vmem>>, vector<1x16xf32>
    %4 = vector.broadcast %3 : vector<1x16xf32> to vector<8x16xf32>
    %5 = arith.addf %2, %4 : vector<8x16xf32>
    %6 = arith.truncf %5 : vector<8x16xf32> to vector<8x16xbf16>
    %c0_5 = arith.constant 0 : index
    %c0_6 = arith.constant 0 : index
    %c0_7 = arith.constant 0 : index
    %7 = vector.load %arg5[%c0_5, %c0_6, %c0_7] : memref<2x16x128xbf16, #tpu.memory_space<vmem>>, vector<1x16x128xbf16>
    %8 = vector.shape_cast %7 : vector<1x16x128xbf16> to vector<16x128xbf16>
    %cst_8 = arith.constant dense<0.000000e+00> : vector<8x128xf32>
    %9 = tpu.matmul %6, %8, %cst_8 {dimension_numbers = #tpu.dot_dimension_numbers<[1], [0], [0], [1], [0, 0, 1, 1], [], []>} : vector<8x16xbf16>, vector<16x128xbf16>, vector<8x128xf32> -> vector<8x128xf32>
    %c0_9 = arith.constant 0 : index
    %c0_10 = arith.constant 0 : index
    %10 = vector.load %arg2[%c0_9, %c0_10] : memref<8x16xbf16, #tpu.memory_space<vmem>>, vector<8x16xbf16>
    %c1 = arith.constant 1 : index
    %c0_11 = arith.constant 0 : index
    %c0_12 = arith.constant 0 : index
    %11 = vector.load %arg5[%c1, %c0_11, %c0_12] : memref<2x16x128xbf16, #tpu.memory_space<vmem>>, vector<1x16x128xbf16>
    %12 = vector.shape_cast %11 : vector<1x16x128xbf16> to vector<16x128xbf16>
    %cst_13 = arith.constant dense<0.000000e+00> : vector<8x128xf32>
    %13 = tpu.matmul %10, %12, %cst_13 {dimension_numbers = #tpu.dot_dimension_numbers<[1], [0], [0], [1], [0, 0, 1, 1], [], []>} : vector<8x16xbf16>, vector<16x128xbf16>, vector<8x128xf32> -> vector<8x128xf32>
    %14 = arith.addf %9, %13 : vector<8x128xf32>
    %c0_14 = arith.constant 0 : index
    %c0_15 = arith.constant 0 : index
    %15 = vector.load %arg6[%c0_14, %c0_15] : memref<1x128xf32, #tpu.memory_space<vmem>>, vector<1x128xf32>
    %16 = vector.broadcast %15 : vector<1x128xf32> to vector<8x128xf32>
    %17 = arith.addf %14, %16 : vector<8x128xf32>
    %c0_16 = arith.constant 0 : index
    %c0_17 = arith.constant 0 : index
    %18 = vector.load %arg7[%c0_16, %c0_17] : memref<8x128xf32, #tpu.memory_space<vmem>>, vector<8x128xf32>
    tpu.vector_store %arg7[%c0_16, %c0_17], %17 {strides = array<i32>} : memref<8x128xf32, #tpu.memory_space<vmem>>, vector<8x128xf32>,
    return
  }
  func.func @transform_0(%arg0: i32) -> (i32, i32) {
    %c0_i32 = arith.constant 0 : i32
    %c0_i32_0 = arith.constant 0 : i32
    return %arg0, %c0_i32 : i32, i32
  }
  func.func @transform_1(%arg0: i32) -> (i32, i32) {
    %c0_i32 = arith.constant 0 : i32
    %c0_i32_0 = arith.constant 0 : i32
    return %arg0, %c0_i32 : i32, i32
  }
  func.func @transform_2(%arg0: i32) -> (i32, i32) {
    %c0_i32 = arith.constant 0 : i32
    %c0_i32_0 = arith.constant 0 : i32
    %c0_i32_1 = arith.constant 0 : i32
    return %c0_i32, %c0_i32_0 : i32, i32
  }
  func.func @transform_3(%arg0: i32) -> (i32, i32) {
    %c0_i32 = arith.constant 0 : i32
    %c0_i32_0 = arith.constant 0 : i32
    %c0_i32_1 = arith.constant 0 : i32
    return %c0_i32, %c0_i32_0 : i32, i32
  }
  func.func @transform_4(%arg0: i32) -> (i32, i32, i32) {
    %c0_i32 = arith.constant 0 : i32
    %c0_i32_0 = arith.constant 0 : i32
    %c0_i32_1 = arith.constant 0 : i32
    %c0_i32_2 = arith.constant 0 : i32
    return %c0_i32, %c0_i32_0, %c0_i32_1 : i32, i32, i32
  }
  func.func @transform_5(%arg0: i32) -> (i32, i32) {
    %c0_i32 = arith.constant 0 : i32
    %c0_i32_0 = arith.constant 0 : i32
    %c0_i32_1 = arith.constant 0 : i32
    return %c0_i32, %c0_i32_0 : i32, i32
  }
  func.func @transform_6(%arg0: i32) -> (i32, i32) {
    %c0_i32 = arith.constant 0 : i32
    %c0_i32_0 = arith.constant 0 : i32
    return %arg0, %c0_i32 : i32, i32
  }
}

</mosaic_0001>

<bundles_post_ra>
// kernel: tpu_custom_call.1
= control target key start
LH: loop header
LB: loop body
LE: loop exit
PB: predicated region body
PF: predicated region fallthrough
CT: control target
= control target key end

     0   :  { %s254_s0 = inlined_call_operand.vmem [shape: bf16[8,32], index: 0, kind: input, shape index: {}]   ;;  %s255_s1 = inlined_call_operand.vmem [shape: bf16[8,16], index: 1, kind: input, shape index: {}]   ;;  %s256_s2 = inlined_call_operand.vmem [shape: bf16[32,16], index: 2, kind: input, shape index: {}]   ;;  %s257_s3 = inlined_call_operand.vmem [shape: f32[1,16], index: 3, kind: input, shape index: {}]   ;;  %s258_s4 = inlined_call_operand.vmem [shape: bf16[2,16,128], index: 4, kind: input, shape index: {}]   ;;  %s259_s5 = inlined_call_operand.vmem [shape: f32[1,128], index: 5, kind: input, shape index: {}]   ;;  %s260_s6 = inlined_call_operand.hbm [shape: f32[8,128], index: 6, kind: output, shape index: {}]  }
   0x1   :  { %v159_v0 = vld [vmem:[%s256_s2 + $0x8] sm:$0xff]  ;;  %v158_v1 = vld [vmem:[%s256_s2] sm:$0xff] }
   0x2   :  { %56 = vmatpush.bf16.msra.mxu0 %v159_v0 }
   0x3   :  { %11 = vsyncpa [#allocation3], 0  ;;  %v25_v2 = vld [vmem:[%s254_s0] sm:$0xf]  ;;  %vm46_vm0 = vcmask 261120   ;;  %v161_v3 = vld [vmem:[%s258_s4 + $0x8] sm:$0xff] }
   0x4   :  { %87 = vmatpush.bf16.msra.mxu1 %v161_v3  ;;  %v160_v4 = vld [vmem:[%s258_s4] sm:$0xff]  ;;  %vm76_vm1 = vcmask 130048   ;;  %s191_s10 = smov [#allocation2]   ;;  %s128_s13 = sshll.u32 %s260_s6, 4  ;;  %s129_s13 = int_to_ptr.hbm [resolvable:$true] %s128_s13 }
   0x5   :  { %109 = vmatpush.bf16.msra.mxu2 %v160_v4  ;;  %v66_v5 = vld [vmem:[%s255_s1] sm:$0xf]  ;;  %s126_s1 = sshll.u32 %s191_s10, 4  ;;  %s127_s1 = int_to_ptr.vmem [resolvable:$true] %s126_s1 }
   0x6   :  { %57 = vmatpush.bf16.msra.mxu0 %v158_v1  ;;  %v163_v6 = vld [vmem:[%s257_s3] ss:$0 sm:$0xff] }
   0x7   :  { %152 = vmatmul.msk.bf16.vlgmr.msra.gmra.mxu1 %vm76_vm1, %v66_v5  ;;  %v164_v13 = vld [vmem:[%s259_s5] ss:$0 sm:$0xff] }
   0x9   :  { %145 = vmatmul.msk.bf16.vlgmr.msra.gmra.mxu0 %vm46_vm0, %v25_v2 }
  0x84   :  { %v89_v11 = vpop.f32.mrf.mxu1 }
  0x86   :  { %v59_v7 = vpop.f32.mrf.mxu0 }
  0x87   :  { %v60_v8 = vadd.f32 %v163_v6, %v59_v7 }
  0x89   :  { %v63_v9 = vpack.c.bf16 %v60_v8, %v60_v8 }
  0x8b   :  { %157 = vmatmul.msk.bf16.vlgmr.msra.gmra.mxu2 %vm76_vm1, %v63_v9 }
  0x8c   :  { %v91_v12 = vpop.f32.mrf.mxu1 }
  0x8e   :  { %v61_v10 = vpop.f32.mrf.mxu0 }
 0x10e   :  { %v111_v14 = vpop.f32.mrf.mxu2 }
 0x10f   :  { %v112_v15 = vadd.f32 %v111_v14, %v89_v11 }
 0x111   :  { %v119_v16 = vadd.f32 %v164_v13, %v112_v15 }
 0x113   :  { %120 = vst [vmem:[#allocation2] sm:$0xff] %v119_v16 }
 0x114   :  { %131 = dma.vmem_to_hbm [thread:$0]  %s127_s1, 128, %s129_s13, [#allocation3]  }
 0x116   :  { %v113_v17 = vpop.f32.mrf.mxu2 }
 0x117   :  { %189 = dma.done.wait [#allocation3], 128  }
 0x118   :  { %190 = vsyncadd [#allocation3], 4294967168 }
 0x119   :  { %136 = vsyncpa [#allocation3], 1 }

</bundles_post_ra>
